<compile_context>
chip_gen: v6e
topology: v6e:2x2x1
jax: 0.10.0
libtpu: 0.0.40
codegen_flags: <defaults>
</compile_context>

<pallas_src>
import jax
import jax.numpy as jnp
from jax.experimental import pallas as pl
from jax.experimental.pallas import tpu as pltpu

LANE_TILE = 256  # lane-dense output tile width (multiple of 128)


def conv_mm_kernel(w_ref, p_ref, b_ref, o_ref):
    """One lane-tile of  out = W @ patches + b.

    w_ref : (Cout, K)   im2col weight matrix, K = 9*Cin (grid-invariant)
    p_ref : (K, TL)     lane-tile of im2col patches (spatial on lanes)
    b_ref : (Cout, 1)   bias + `other`, pre-folded in the wrapper
    o_ref : (Cout, TL)  lane-dense output tile
    """
    acc = jnp.dot(w_ref[...], p_ref[...], preferred_element_type=jnp.float32)
    o_ref[...] = (acc + b_ref[...]).astype(o_ref.dtype)


def conv2d_3x3_plus_other(x_nchw, weight_oihw, bias, other=0.0):
    """Forward pass of Model: Conv2d(3,8,3,stride=1,padding=1)(x) + other."""
    N, Cin, H, W = x_nchw.shape
    Cout = weight_oihw.shape[0]
    K = 9 * Cin
    L = N * H * W

    # ---- wrapper glue: zero-pad + im2col (taps/channels on sublanes, spatial on lanes)
    x_pad = jnp.pad(x_nchw, ((0, 0), (0, 0), (1, 1), (1, 1)))
    taps = []
    for kh in range(3):
        for kw in range(3):
            taps.append(x_pad[:, :, kh:kh + H, kw:kw + W])      # (N, Cin, H, W)
    patches = jnp.stack(taps, axis=2)                           # (N, Cin, 9, H, W)
    patches = patches.transpose(1, 2, 0, 3, 4).reshape(K, L)    # k = i*9 + kh*3 + kw

    # Pad the lane (spatial) dimension up to a multiple of LANE_TILE.
    num_tiles = (L + LANE_TILE - 1) // LANE_TILE
    L_pad = num_tiles * LANE_TILE
    if L_pad != L:
        patches = jnp.pad(patches, ((0, 0), (0, L_pad - L)))

    # Weight OIHW flattened row-major matches the patch k-ordering above.
    w_mat = weight_oihw.reshape(Cout, K).astype(jnp.float32)
    # Fold `other` (scalar) into the bias column.
    # TODO(synk): tensor-valued `other` with broadcasting is handled outside the kernel.
    b_col = (bias.astype(jnp.float32)
             + jnp.asarray(other, jnp.float32)).reshape(Cout, 1)

    cost = pl.CostEstimate(
        flops=2 * Cout * K * L_pad,
        transcendentals=0,
        bytes_accessed=4 * (Cout * K + K * L_pad + Cout + Cout * L_pad),
    )

    out_mat = pl.pallas_call(
        conv_mm_kernel,
        out_shape=jax.ShapeDtypeStruct((Cout, L_pad), jnp.float32),
        grid=(num_tiles,),
        in_specs=[
            pl.BlockSpec((Cout, K), lambda j: (0, 0)),           # weights (invariant)
            pl.BlockSpec((K, LANE_TILE), lambda j: (0, j)),      # patches lane-tile
            pl.BlockSpec((Cout, 1), lambda j: (0, 0)),           # bias+other (invariant)
        ],
        out_specs=pl.BlockSpec((Cout, LANE_TILE), lambda j: (0, j)),
        compiler_params=pltpu.CompilerParams(
            dimension_semantics=("parallel",)),
        cost_estimate=cost,
    )(w_mat, patches, b_col)

    # (Cout, L) -> (N, Cout, H, W), PyTorch's NCHW convention.
    out = out_mat[:, :L].reshape(Cout, N, H, W)
    return jnp.transpose(out, (1, 0, 2, 3))


if __name__ == "__main__":
    key = jax.random.PRNGKey(0)
    kx, kw_, kb = jax.random.split(key, 3)

    # Small shapes consistent with the module: Conv2d(3 -> 8, 3x3, pad=1).
    N, Cin, H, W = 2, 3, 16, 16
    Cout = 8

    x = jax.random.normal(kx, (N, Cin, H, W), jnp.float32)
    # Deterministic parameter init (synthetic; not a checkpoint load).
    weight = jax.random.normal(kw_, (Cout, Cin, 3, 3), jnp.float32) * 0.1
    bias = jax.random.normal(kb, (Cout,), jnp.float32) * 0.1

    fwd = jax.jit(conv2d_3x3_plus_other)
    # forward(x1) with kwargs.get('other', 0) -> other defaults to 0.
    out = jax.block_until_ready(fwd(x, weight, bias, 0.0))

    # Reference check against XLA conv.
    ref = jax.lax.conv_general_dilated(
        x, weight, window_strides=(1, 1), padding=((1, 1), (1, 1)),
        dimension_numbers=("NCHW", "OIHW", "NCHW")) + bias[None, :, None, None]
    assert out.shape == (N, Cout, H, W)
    assert jnp.allclose(out, ref, atol=1e-4, rtol=1e-4)

    print("KERNEL_OK")
</pallas_src>

<mosaic_0001>
module attributes {stable_mosaic.version = 11 : i64} {
  func.func @conv_mm_kernel(%arg0: i32, %arg1: memref<8x27xf32, #tpu.memory_space<vmem>>, %arg2: memref<27x256xf32, #tpu.memory_space<vmem>>, %arg3: memref<8x1xf32, #tpu.memory_space<vmem>>, %arg4: memref<8x256xf32, #tpu.memory_space<vmem>>) attributes {dimension_semantics = [#tpu.dimension_semantics<parallel>], iteration_bounds = array<i64: 2>, scalar_prefetch = 0 : i64, scratch_operands = 0 : i64, tpu.core_type = #tpu.core_type<tc>, window_params = [{pipeline_mode = #tpu.pipeline_mode<synchronous>, transform_indices = @transform_0, window_bounds = array<i64: 8, 27>}, {transform_indices = @transform_1, window_bounds = array<i64: 27, 256>}, {pipeline_mode = #tpu.pipeline_mode<synchronous>, transform_indices = @transform_2, window_bounds = array<i64: 8, 1>}, {transform_indices = @transform_3, window_bounds = array<i64: 8, 256>}]} {
    %c0 = arith.constant 0 : index
    %c0_0 = arith.constant 0 : index
    %0 = vector.load %arg1[%c0, %c0_0] : memref<8x27xf32, #tpu.memory_space<vmem>>, vector<8x27xf32>
    %c0_1 = arith.constant 0 : index
    %c0_2 = arith.constant 0 : index
    %1 = vector.load %arg2[%c0_1, %c0_2] : memref<27x256xf32, #tpu.memory_space<vmem>>, vector<27x256xf32>
    %cst = arith.constant dense<0.000000e+00> : vector<8x256xf32>
    %2 = tpu.matmul %0, %1, %cst {dimension_numbers = #tpu.dot_dimension_numbers<[1], [0], [0], [1], [0, 0, 1, 1], [], []>} : vector<8x27xf32>, vector<27x256xf32>, vector<8x256xf32> -> vector<8x256xf32>
    %c0_3 = arith.constant 0 : index
    %c0_4 = arith.constant 0 : index
    %3 = vector.load %arg3[%c0_3, %c0_4] : memref<8x1xf32, #tpu.memory_space<vmem>>, vector<8x1xf32>
    %4 = vector.broadcast %3 : vector<8x1xf32> to vector<8x256xf32>
    %5 = arith.addf %2, %4 : vector<8x256xf32>
    %c0_5 = arith.constant 0 : index
    %c0_6 = arith.constant 0 : index
    %6 = vector.load %arg4[%c0_5, %c0_6] : memref<8x256xf32, #tpu.memory_space<vmem>>, vector<8x256xf32>
    tpu.vector_store %arg4[%c0_5, %c0_6], %5 {strides = array<i32>} : memref<8x256xf32, #tpu.memory_space<vmem>>, vector<8x256xf32>,
    return
  }
  func.func @transform_0(%arg0: i32) -> (i32, i32) {
    %c0_i32 = arith.constant 0 : i32
    %c0_i32_0 = arith.constant 0 : i32
    %c0_i32_1 = arith.constant 0 : i32
    return %c0_i32, %c0_i32_0 : i32, i32
  }
  func.func @transform_1(%arg0: i32) -> (i32, i32) {
    %c0_i32 = arith.constant 0 : i32
    %c0_i32_0 = arith.constant 0 : i32
    return %c0_i32, %arg0 : i32, i32
  }
  func.func @transform_2(%arg0: i32) -> (i32, i32) {
    %c0_i32 = arith.constant 0 : i32
    %c0_i32_0 = arith.constant 0 : i32
    %c0_i32_1 = arith.constant 0 : i32
    return %c0_i32, %c0_i32_0 : i32, i32
  }
  func.func @transform_3(%arg0: i32) -> (i32, i32) {
    %c0_i32 = arith.constant 0 : i32
    %c0_i32_0 = arith.constant 0 : i32
    return %c0_i32, %arg0 : i32, i32
  }
}

</mosaic_0001>

<bundles_post_ra>
// kernel: conv2d_3x3_plus_other.1
= control target key start
LH: loop header
LB: loop body
LE: loop exit
PB: predicated region body
PF: predicated region fallthrough
CT: control target
= control target key end

     0   :  { %s458_s12 = smov 0   ;;  %s460_s13 = smov 0   ;;  %s516_s0 = inlined_call_operand.vmem [shape: f32[8,27], index: 0, kind: input, shape index: {}]   ;;  %s517_s1 = inlined_call_operand.vmem [shape: f32[27,512], index: 1, kind: input, shape index: {}]   ;;  %s518_s2 = inlined_call_operand.vmem [shape: f32[8,1], index: 2, kind: input, shape index: {}]   ;;  %s519_s3 = inlined_call_operand.vmem [shape: f32[8,512], index: 3, kind: output, shape index: {}]  }
   0x1   :  { %s462_s14 = smov 0  }
   0x2 LB: > { %s368_s15 = sadd.s32 4294967295, %s434_s14   ;;  %s475_s16 = sadd.s32 1, %s434_s14   ;;  %s434_s14 = sphi %s462_s14, %s522_s14   ;;  %s430_s13 = sphi %s460_s13, %s521_s13   ;;  %s426_s12 = sphi %s458_s12, %s520_s12  }
   0x3   : > { %s38_s17 = ssub.s32 %s434_s14, %s475_s16  ;;  %s41_s18 = sadd.s32 1, %s430_s13 }
   0x4   : > { %p39_p0 = scmp.eq.s32.totalorder %s38_s17, 0  ;;  %p48_p1 = scmp.ne.s32.totalorder %s430_s13, %s426_s12 }
   0x5   : > { %p49_p2 = scmp.eq.s32.totalorder %s434_s14, 0  ;;  %p371_p4 = scmp.ge.s32.totalorder %s434_s14, 2 }
   0x6   : > { %s484_s19 = scalar_select %p39_p0, %s430_s13, %s41_s18  }
   0x7   : > { %p50_p3 = por %p49_p2, %p48_p1  ;;  %127 = sbr.rel (%p371_p4) target bundleno = 20 (0x14), region = 24 }
   0xc   : > { %130 = sbr.rel (!%p50_p3) target bundleno = 20 (0x14), region = 28  ;;  %s132_s20 = sand.u32 (%p50_p3), 1, %s430_s13  }
   0xd   : > { %s384_s21 = sshll.u32 (%p50_p3), %s434_s14, 4  ;;  %s372_s22 = sshll.u32 (%p50_p3), %s132_s20, 6 }
   0xe   : > { %s137_s25 = scalar_lea.vmem (%p50_p3), %s517_s1, %s384_s21  ;;  %s134_s26 = scalar_lea.vmem (%p50_p3), [#allocation2], %s372_s22 }
   0xf   : > { %v150_v0 = vld [vmem:[%s137_s25] sm:$0xff] (%p50_p3)  ;;  %v152_v1 = vld [vmem:[%s137_s25 + $0x8] sm:$0xff] (%p50_p3) }
  0x10   : > { %v154_v2 = vld [vmem:[%s137_s25 + $0x20] sm:$0xff] (%p50_p3)  ;;  %151 = vst [vmem:[%s134_s26] sm:$0xff] (%p50_p3), %v150_v0  ;;  %153 = vst [vmem:[%s134_s26 + $0x8] sm:$0xff] (%p50_p3), %v152_v1  ;;  %v156_v3 = vld [vmem:[%s137_s25 + $0x28] sm:$0xff] (%p50_p3) }
  0x11   : > { %155 = vst [vmem:[%s134_s26 + $0x10] sm:$0xff] %v154_v2  ;;  %v158_v4 = vld [vmem:[%s137_s25 + $0x40] sm:$0xff]  ;;  %v160_v5 = vld [vmem:[%s137_s25 + $0x48] sm:$0xff]  ;;  %157 = vst [vmem:[%s134_s26 + $0x18] sm:$0xff] %v156_v3 }
  0x12   : > { %159 = vst [vmem:[%s134_s26 + $0x20] sm:$0xff] %v158_v4  ;;  %161 = vst [vmem:[%s134_s26 + $0x28] sm:$0xff] %v160_v5  ;;  %v162_v6 = vld [vmem:[%s137_s25 + $0x60] sm:$0xff]  ;;  %v164_v7 = vld [vmem:[%s137_s25 + $0x68] sm:$0xff] }
  0x13   : > { %163 = vst [vmem:[%s134_s26 + $0x30] sm:$0xff] %v162_v6  ;;  %165 = vst [vmem:[%s134_s26 + $0x38] sm:$0xff] %v164_v7 }
  0x14 PF: > { %p375_p5 = scmp.ge.s32.totalorder %s434_s14, 1  ;;  %p170_p6 = scmp.lt.s32.totalorder %s434_s14, 3 }
  0x16   : > { %p171_p7 = pnand %p375_p5, %p170_p6 }
  0x17   : > { %s177_s27 = sand.u32 (!%p171_p7), 1, %s426_s12   ;;  %s377_s7 = sshll.u32 (!%p171_p7), %s368_s15, 1 }
  0x18   : > { %174 = sbr.rel (%p171_p7) target bundleno = 237 (0xed), region = 51  ;;  %s376_s28 = sshll.u32 (!%p171_p7), %s177_s27, 6 }
  0x19   : > { %s179_s4 = scalar_lea.vmem (!%p171_p7), [#allocation2], %s376_s28  ;;  %p202_p8 = scmp.lt.s32.totalorder (!%p171_p7), %s377_s7, 3 }
  0x1d   : > { %vm226_vm0 = vcmask 1042432   ;;  %v436_v8 = vmov 0.0   ;;  %v437_v9 = vmov 0   ;;  %v216_v10 = vld [vmem:[%s518_s2] sm:$0xff]  ;;  %v215_v11 = vld [vmem:[%s179_s4 + $0x38] sm:$0x7] }
  0x1e   : > { %297 = vmatprep.mubr.f32.mxu0 %v436_v8  ;;  %411 = vset.pattern.permute.xlu0 %v437_v9  ;;  %v214_v12 = vld [vmem:[%s179_s4 + $0x30] sm:$0x7]  ;;  %v213_v13 = vld [vmem:[%s179_s4 + $0x28] sm:$0xff]  ;;  %v212_v14 = vld [vmem:[%s179_s4 + $0x20] sm:$0xff]  ;;  %vm222_vm1 = vcmask 220160   ;;  %s524_s7 = smov (!%p202_p8, %s377_s7), 3 }
  0x1f   : > { %219 = vperm.xlu0 %411, %v216_v10   ;;  %379 = vmatprep.subr.msk.mxu0 %vm226_vm0, %v215_v11  ;;  %v211_v15 = vld [vmem:[%s179_s4 + $0x18] sm:$0xff]  ;;  %v210_v16 = vld [vmem:[%s179_s4 + $0x10] sm:$0xff]  ;;  %v209_v17 = vld [vmem:[%s179_s4 + $0x8] sm:$0xff]  ;;  %s378_s8 = sshll.u32 %s524_s7, 3 }
  0x20   : > { %380 = vmatpush1.msk.msra.mxu0 %vm226_vm0, %v214_v12  ;;  %v208_v18 = vld [vmem:[%s179_s4] sm:$0xff]  ;;  %s205_s11 = scalar_lea.vmem %s519_s3, %s378_s8 }
  0x21   : > { %259 = vmatprep.subr.mxu0 %v213_v13  ;;  %v207_v19 = vld [vmem:[%s516_s0] sm:$0xff] }
  0x22   : > { %260 = vmatpush1.msra.mxu0 %v212_v14 }
  0x23   : > { %261 = vmatprep.subr.mxu0 %v211_v15 }
  0x24   : > { %262 = vmatpush1.msra.mxu0 %v210_v16 }
  0x25   : > { %263 = vmatprep.subr.mxu0 %v209_v17 }
  0x26   : > { %264 = vmatpush1.msra.mxu0 %v208_v18 }
  0x27   : > { %381 = vmatmul.mubr.msk.f32.vlgmr.msra.gmra.mxu0 %vm222_vm1, %v207_v19 }
  0x9a   : > { %v220_v20 = vpop.permute.xlu0 %219 }
  0xe7   : > { %v299_v21 = vpop.f32.mrf.mxu0 }
  0xe8   : > { %v300_v22 = vadd.f32 %v299_v21, %v220_v20 }
  0xe9   : > { %v301_v23 = vpop.f32.mrf.mxu0 }
  0xea   : > { %304 = vst [vmem:[%s205_s11] sm:$0xff] %v300_v22  ;;  %v302_v24 = vadd.f32 %v301_v23, %v220_v20 }
  0xec   : > { %305 = vst [vmem:[%s205_s11 + $0x8] sm:$0xff] %v302_v24 }
  0xed PF: > { %p10_p9 = scmp.ge.s32.totalorder %s475_s16, 4   ;;  %s520_s12 = smov %s430_s13 }
  0xee   : > { %s521_s13 = smov %s484_s19  ;;  %s522_s14 = smov %s475_s16 }
  0xef   :  { %12 = sbr.rel (!%p10_p9) target bundleno = 2 (0x2), region = 90 }

</bundles_post_ra>
